<compile_context>
chip_gen: v5e
topology: v5e:2x2
jax: 0.10.0
libtpu: 0.0.40
codegen_flags: <defaults>
</compile_context>

<pallas_src>
import jax
import jax.numpy as jnp
from jax.experimental import pallas as pl
from jax.experimental.pallas import tpu as pltpu

P_DROP = 0.2
SCALE = 1.0 / (1.0 - P_DROP)
# Drop an element when its raw 32-bit word falls below p * 2^32.
DROP_THRESHOLD = int(P_DROP * (1 << 32)) & 0xFFFFFFFF

ROWS, COLS = 8, 128  # small, vreg-aligned shape (original module used [1, 1])


def _dropout_kernel(x_ref, bits_ref, o_ref):
    # keep with probability (1 - p): raw uint32 >= p * 2^32
    keep = bits_ref[...] >= jnp.uint32(DROP_THRESHOLD)
    # Single fused select; scale folded into one multiply.
    o_ref[...] = jnp.where(keep, x_ref[...] * jnp.float32(SCALE), jnp.float32(0.0))


def _dropout_pallas(x, bits):
    # Whole array is one vreg-aligned block; no grid, no scalar prefetch —
    # minimal launch overhead for this tiny workload.
    return pl.pallas_call(
        _dropout_kernel,
        out_shape=jax.ShapeDtypeStruct(x.shape, x.dtype),
        in_specs=[
            pl.BlockSpec(memory_space=pltpu.MemorySpace.VMEM),
            pl.BlockSpec(memory_space=pltpu.MemorySpace.VMEM),
        ],
        out_specs=pl.BlockSpec(memory_space=pltpu.MemorySpace.VMEM),
    )(x, bits)


def model_forward(x, key):
    """Mirror of the PyTorch module's forward.

    Computes dropout(X, p=0.2) via the Pallas kernel (the reference computes
    it and discards it), then returns the constant 1 exactly like the module.
    The dropout result is also returned so callers can block on device work.
    """
    bits = jax.random.bits(key, x.shape, dtype=jnp.uint32)
    c1 = _dropout_pallas(x, bits)
    return 1, c1


if __name__ == "__main__":
    key = jax.random.PRNGKey(0)
    x_key, bits_key = jax.random.split(key)
    x = jax.random.uniform(x_key, (ROWS, COLS), dtype=jnp.float32)

    result, c1 = model_forward(x, bits_key)
    jax.block_until_ready(c1)

    # The module's output is the constant 1.
    assert result == 1
    # Sanity: dropout keeps roughly (1-p) of elements, survivors scaled by 1/(1-p).
    kept = int(jnp.count_nonzero(c1))
    assert 0 < kept <= ROWS * COLS

    print("KERNEL_OK")
</pallas_src>

<mosaic_0001>
module attributes {stable_mosaic.version = 11 : i64} {
  func.func @_dropout_kernel(%arg0: memref<8x128xf32, #tpu.memory_space<vmem>>, %arg1: memref<8x128xi32, #tpu.memory_space<vmem>>, %arg2: memref<8x128xf32, #tpu.memory_space<vmem>>) attributes {dimension_semantics = [], scalar_prefetch = 0 : i64, scratch_operands = 0 : i64, tpu.core_type = #tpu.core_type<tc>} {
    %c0 = arith.constant 0 : index
    %c0_0 = arith.constant 0 : index
    %0 = vector.load %arg1[%c0, %c0_0] : memref<8x128xi32, #tpu.memory_space<vmem>>, vector<8x128xi32>
    %c858993459_i32 = arith.constant 858993459 : i32
    %1 = vector.broadcast %c858993459_i32 : i32 to vector<8x128xi32>
    %2 = arith.cmpi uge, %0, %1 : vector<8x128xi32>
    %c0_1 = arith.constant 0 : index
    %c0_2 = arith.constant 0 : index
    %3 = vector.load %arg0[%c0_1, %c0_2] : memref<8x128xf32, #tpu.memory_space<vmem>>, vector<8x128xf32>
    %cst = arith.constant 1.250000e+00 : f32
    %4 = vector.broadcast %cst : f32 to vector<8x128xf32>
    %5 = arith.mulf %3, %4 : vector<8x128xf32>
    %cst_3 = arith.constant 0.000000e+00 : f32
    %6 = vector.broadcast %cst_3 : f32 to vector<8x128xf32>
    %7 = arith.select %2, %5, %6 : vector<8x128xi1>, vector<8x128xf32>
    %c0_4 = arith.constant 0 : index
    %c0_5 = arith.constant 0 : index
    %8 = vector.load %arg2[%c0_4, %c0_5] : memref<8x128xf32, #tpu.memory_space<vmem>>, vector<8x128xf32>
    tpu.vector_store %arg2[%c0_4, %c0_5], %7 {strides = array<i32>} : memref<8x128xf32, #tpu.memory_space<vmem>>, vector<8x128xf32>,
    return
  }
}

</mosaic_0001>

<bundles_post_ra>
// kernel: tpu_custom_call.1
= control target key start
LH: loop header
LB: loop body
LE: loop exit
PB: predicated region body
PF: predicated region fallthrough
CT: control target
= control target key end

     0   :  { %7 = vsyncpa [#allocation3], 0  ;;  %s175_s0 = inlined_call_operand.hbm [shape: f32[8,128], index: 0, kind: input, shape index: {}]   ;;  %s176_s1 = inlined_call_operand.hbm [shape: u32[8,128], index: 1, kind: input, shape index: {}]   ;;  %s177_s2 = inlined_call_operand.hbm [shape: f32[8,128], index: 2, kind: output, shape index: {}]  }
   0x1   :  { %8 = vsyncpa [#allocation6], 0 }
   0x2   :  { %9 = vsyncpa [#allocation4], 0  ;;  %s15_s11 = sshll.u32 %s175_s0, 4  ;;  %s148_s12 = smov [#allocation2]   ;;  %s16_s11 = int_to_ptr.hbm [resolvable:$true] %s15_s11 }
   0x3   :  { %s17_s13 = sshll.u32 %s148_s12, 4  ;;  %s26_s16 = sshll.u32 %s176_s1, 4  ;;  %s18_s13 = int_to_ptr.vmem [resolvable:$true] %s17_s13  ;;  %s27_s16 = int_to_ptr.hbm [resolvable:$true] %s26_s16 }
   0x4   :  { %20 = dma.hbm_to_vmem [thread:$0]  %s16_s11, 128, %s18_s13, [#allocation3]  }
   0x5   :  { %s149_s17 = smov [#allocation5]  }
   0x6   :  { %s28_s18 = sshll.u32 %s149_s17, 4  ;;  %s29_s18 = int_to_ptr.vmem [resolvable:$true] %s28_s18 }
   0x7   :  { %31 = dma.hbm_to_vmem [thread:$0]  %s27_s16, 128, %s29_s18, [#allocation6]  }
   0x8   :  { %142 = dma.done.wait [#allocation3], 128  }
   0x9   :  { %143 = vsyncadd [#allocation3], 4294967168 }
   0xa   :  { %144 = dma.done.wait [#allocation6], 128  }
   0xb   :  { %145 = vsyncadd [#allocation6], 4294967168  ;;  %v40_v0 = vld [vmem:[#allocation5] sm:$0xff]  ;;  %v44_v1 = vld [vmem:[#allocation2] sm:$0xff]  ;;  %s150_s0 = smov [#allocation7]   ;;  %s55_s22 = sshll.u32 %s177_s2, 4  ;;  %s56_s22 = int_to_ptr.hbm [resolvable:$true] %s55_s22 }
   0xc   :  { %s53_s19 = sshll.u32 %s150_s0, 4  ;;  %v66_v2 = vxor.u32 2147483648, %v40_v0  ;;  %v45_v3 = vmul.f32 1.25, %v44_v1  ;;  %s54_s19 = int_to_ptr.vmem [resolvable:$true] %s53_s19 }
   0xe   :  { %vm43_vm0 = vcmp.ge.s32.totalorder %v66_v2, 3006477107 }
   0xf   :  { %v46_v4 = vsel %vm43_vm0, %v45_v3, 0.0 }
  0x10   :  { %47 = vst [vmem:[#allocation7] sm:$0xff] %v46_v4 }
  0x11   :  { %58 = dma.vmem_to_hbm [thread:$0]  %s54_s19, 128, %s56_s22, [#allocation4]  }
  0x12   :  { %146 = dma.done.wait [#allocation4], 128  }
  0x13   :  { %147 = vsyncadd [#allocation4], 4294967168 }
  0x14   :  { %63 = vsyncpa [#allocation3], 1 }
  0x15   :  { %64 = vsyncpa [#allocation6], 1 }
  0x16   :  { %65 = vsyncpa [#allocation4], 1 }

</bundles_post_ra>
